<compile_context>
chip_gen: v7x
topology: tpu7x:2x2x1
jax: 0.10.0
libtpu: 0.0.40
codegen_flags: <defaults>
</compile_context>

<pallas_src>
import functools

import jax
import jax.numpy as jnp
from jax import lax
from jax.experimental import pallas as pl
from jax.experimental.pallas import tpu as pltpu


def _cdiv(a, b):
    return -(-a // b)


def _round_up(a, b):
    return _cdiv(a, b) * b


# ----------------------------------------------------------------------- kernels

def _conv1x1_vpu_kernel(x_ref, w_ref, b_ref, o_ref, *, chunk):
    """Tiny-c_in path: unrolled VPU broadcast-FMA chain over the channel
    reduction, processed in `chunk`-lane sub-blocks (accumulator stays in vregs)."""
    # x_ref: (1, c_in, t_hw)  w_ref: (t_co, c_in)  b_ref: (t_co, 1)  o_ref: (1, t_co, t_hw)
    c_in = x_ref.shape[1]
    t_hw = x_ref.shape[2]
    # Hoisted once per grid step: weight columns + bias, cast to f32 outside the loop.
    w_cols = [w_ref[:, k:k + 1].astype(jnp.float32) for k in range(c_in)]   # (t_co, 1) each
    bias = b_ref[...].astype(jnp.float32)                                   # (t_co, 1)

    n_chunks = t_hw // chunk

    def body(c, carry):
        off = pl.multiple_of(c * chunk, chunk)
        xs = x_ref[0, :, pl.ds(off, chunk)].astype(jnp.float32)             # (c_in, chunk)
        acc = w_cols[0] * xs[0:1, :]
        for k in range(1, c_in):
            acc = acc + w_cols[k] * xs[k:k + 1, :]
        o_ref[0, :, pl.ds(off, chunk)] = (acc + bias).astype(o_ref.dtype)
        return carry

    lax.fori_loop(0, n_chunks, body, 0, unroll=min(n_chunks, 8))


def _conv1x1_mxu_kernel(x_ref, w_ref, b_ref, o_ref):
    """General path: MXU matmul over the channel reduction, f32 accumulation."""
    acc = jnp.dot(w_ref[...], x_ref[0], preferred_element_type=jnp.float32)
    o_ref[0] = (acc + b_ref[...].astype(jnp.float32)).astype(o_ref.dtype)


# ----------------------------------------------------------------------- sizing

def _vmem_capacity_bytes():
    try:
        return int(pltpu.get_tpu_info().vmem_capacity_bytes)
    except Exception:
        return 64 << 20        # conservative fallback: v7x per-TensorCore VMEM


def _pick_spatial_tile(hw, outer_steps, footprint_fn, budget, min_steps):
    """Largest lane tile (multiple of 128) whose per-step footprint fits `budget`
    while still leaving >= min_steps total grid steps for pipelining/megacore."""
    hw_pad = _round_up(hw, 128)
    cands = {128, 256, 512}
    t = 1024
    while t <= (128 << 10):    # allow very wide tiles when channel counts are tiny
        cands.add(t)
        t *= 2
    cands.add(hw_pad)
    cands = sorted((c for c in cands if c <= hw_pad), reverse=True)
    in_budget = [t for t in cands if footprint_fn(t) <= budget]
    if not in_budget:
        return 128
    enough = [t for t in in_budget if outer_steps * _cdiv(hw, t) >= min_steps]
    return enough[0] if enough else in_budget[0]


# ----------------------------------------------------------------------- wrapper

def conv1x1_pallas(x_nchw, weight, bias, *, out_dtype=None, min_grid_steps=8):
    """1x1 conv with bias, matching nn.Conv2d(c_in, c_out, kernel_size=1, bias=True).

    x_nchw: (N, c_in, H, W)
    weight: (c_out, c_in)   (squeezed 1x1 conv kernel)
    bias:   (c_out,)
    out_dtype: defaults to x dtype; pass jnp.bfloat16 to halve store-side bytes.
    """
    N, c_in, H, W = x_nchw.shape
    c_out = weight.shape[0]
    HW = H * W
    out_dtype = jnp.dtype(x_nchw.dtype if out_dtype is None else out_dtype)

    x3 = x_nchw.reshape(N, c_in, HW)          # free view: rows = channels, lanes = spatial
    # Never cast x here (that would be a separate full HBM pass); only match the
    # tiny weight to x's dtype when x already arrives as bf16.
    w = weight.astype(jnp.bfloat16) if x3.dtype == jnp.bfloat16 else weight
    b2 = bias.reshape(c_out, 1).astype(jnp.float32)

    x_isz = jnp.dtype(x3.dtype).itemsize
    w_isz = jnp.dtype(w.dtype).itemsize
    o_isz = out_dtype.itemsize

    # c_out tiling keeps the resident weight block inside v7x's 64 MiB VMEM and
    # aligns M to the 256-wide MXU; small c_out => a single (overhead-free) block.
    t_co = c_out if c_out <= 512 else 256
    n_co = _cdiv(c_out, t_co)
    w_bufs = 1 if n_co == 1 else 2            # grid-invariant weight is single-buffered

    vmem_cap = _vmem_capacity_bytes()
    tile_budget = min(int(0.45 * vmem_cap), 48 << 20)

    def footprint(t):
        return (2 * c_in * t * x_isz          # double-buffered x tile
                + 2 * t_co * t * o_isz        # double-buffered out tile
                + w_bufs * (t_co * c_in * w_isz + t_co * 4))   # weight + bias buffers

    t_hw = _pick_spatial_tile(HW, N * n_co, footprint, tile_budget, min_grid_steps)
    n_s = _cdiv(HW, t_hw)
    grid = (N, n_s, n_co)                     # co innermost: x tile stays resident

    # VPU path for tiny channel reductions (MXU would run nearly empty at small K).
    vpu_threshold = 16 if x3.dtype == jnp.bfloat16 else 8
    if c_in <= vpu_threshold:
        chunk = 512 if t_hw % 512 == 0 else t_hw
        kernel = functools.partial(_conv1x1_vpu_kernel, chunk=chunk)
    else:
        kernel = _conv1x1_mxu_kernel

    fp = footprint(t_hw)
    vmem_limit = int(min(max(int(1.5 * fp) + (2 << 20), 32 << 20), int(0.6 * vmem_cap)))
    vmem_limit = max(vmem_limit, fp + (2 << 20))

    cost = pl.CostEstimate(
        flops=2 * N * HW * c_in * c_out,
        bytes_accessed=int(N * c_in * HW * x_isz + c_out * c_in * w_isz
                           + c_out * 4 + N * c_out * HW * o_isz),
        transcendentals=0,
    )

    def build(param_pipeline_mode):
        extra = {} if param_pipeline_mode is None else {"pipeline_mode": param_pipeline_mode}
        return pl.pallas_call(
            kernel,
            out_shape=jax.ShapeDtypeStruct((N, c_out, HW), out_dtype),
            grid_spec=pltpu.PrefetchScalarGridSpec(
                num_scalar_prefetch=0,
                grid=grid,
                in_specs=[
                    pl.BlockSpec((1, c_in, t_hw), lambda n, s, co: (n, 0, s)),
                    pl.BlockSpec((t_co, c_in), lambda n, s, co: (co, 0), **extra),
                    pl.BlockSpec((t_co, 1), lambda n, s, co: (co, 0), **extra),
                ],
                out_specs=pl.BlockSpec((1, t_co, t_hw), lambda n, s, co: (n, co, s)),
            ),
            compiler_params=pltpu.CompilerParams(
                dimension_semantics=("parallel", "parallel", "parallel"),
                vmem_limit_bytes=vmem_limit,
            ),
            cost_estimate=cost,
        )

    if n_co == 1:
        # Grid-invariant weight/bias: request single buffering (halves their VMEM
        # footprint, removes redundant DMA); fall back to default pipelining if
        # this Pallas version rejects Buffered(1).
        try:
            out = build(pl.Buffered(1))(x3, w, b2)
        except Exception:
            out = build(None)(x3, w, b2)
    else:
        out = build(None)(x3, w, b2)

    # TODO(synk): for c_in in the thousands add a c_in "arbitrary" grid axis with an
    # f32 VMEM accumulator so the K-blocks of x/weight also stay small on v7x.
    return out.reshape(N, c_out, H, W)        # already NCHW: free reshape, no transpose


def init_params(key, c_in, c_out):
    """Deterministic init mirroring PyTorch Conv2d defaults (kaiming-uniform-ish)."""
    kw, kb = jax.random.split(key)
    fan_in = c_in * 1 * 1
    bound_w = jnp.sqrt(3.0 / fan_in)          # kaiming_uniform(a=sqrt(5))
    bound_b = 1.0 / jnp.sqrt(fan_in)
    weight = jax.random.uniform(kw, (c_out, c_in), jnp.float32, -bound_w, bound_w)
    bias = jax.random.uniform(kb, (c_out,), jnp.float32, -bound_b, bound_b)
    return weight, bias


if __name__ == "__main__":
    key = jax.random.PRNGKey(0)
    k1, k2, k3, k4 = jax.random.split(key, 4)

    # Case 1: tiny channel count (VPU path), 128-aligned spatial extent.
    N, c_in, H, W = 2, 4, 16, 16
    c_out = 8
    x = jax.random.normal(k1, (N, c_in, H, W), jnp.float32)
    weight, bias = init_params(k2, c_in, c_out)
    y = jax.block_until_ready(conv1x1_pallas(x, weight, bias))
    y_ref = jnp.einsum("nchw,oc->nohw", x, weight) + bias[None, :, None, None]
    assert y.shape == (N, c_out, H, W)
    assert jnp.allclose(y, y_ref, atol=1e-5, rtol=1e-5)

    # Case 2: larger channel count (MXU path) + non-128-aligned spatial extent
    # (exercises the cdiv partial-block masking path).
    N2, c_in2, H2, W2, c_out2 = 2, 32, 10, 10, 16
    x2 = jax.random.normal(k3, (N2, c_in2, H2, W2), jnp.float32)
    weight2, bias2 = init_params(k4, c_in2, c_out2)
    y2 = jax.block_until_ready(conv1x1_pallas(x2, weight2, bias2))
    y2_ref = jnp.einsum("nchw,oc->nohw", x2, weight2) + bias2[None, :, None, None]
    assert y2.shape == (N2, c_out2, H2, W2)
    assert jnp.allclose(y2, y2_ref, atol=5e-2, rtol=5e-2)

    print("KERNEL_OK")
</pallas_src>

<mosaic_0001>
module attributes {stable_mosaic.version = 11 : i64} {
  func.func @_conv1x1_vpu_kernel(%arg0: i32, %arg1: i32, %arg2: i32, %arg3: memref<1x4x256xf32, #tpu.memory_space<vmem>>, %arg4: memref<8x4xf32, #tpu.memory_space<vmem>>, %arg5: memref<8x1xf32, #tpu.memory_space<vmem>>, %arg6: memref<1x8x256xf32, #tpu.memory_space<vmem>>) attributes {dimension_semantics = [#tpu.dimension_semantics<parallel>, #tpu.dimension_semantics<parallel>, #tpu.dimension_semantics<parallel>], iteration_bounds = array<i64: 2, 1, 1>, scalar_prefetch = 0 : i64, scratch_operands = 0 : i64, tpu.core_type = #tpu.core_type<tc>, window_params = [{transform_indices = @transform_0, window_bounds = array<i64: 1, 4, 256>}, {pipeline_mode = #tpu.pipeline_mode<synchronous>, transform_indices = @transform_1, window_bounds = array<i64: 8, 4>}, {pipeline_mode = #tpu.pipeline_mode<synchronous>, transform_indices = @transform_2, window_bounds = array<i64: 8, 1>}, {transform_indices = @transform_3, window_bounds = array<i64: 1, 8, 256>}]} {
    %c0 = arith.constant 0 : index
    %c0_0 = arith.constant 0 : index
    %0 = vector.load %arg4[%c0, %c0_0] : memref<8x4xf32, #tpu.memory_space<vmem>>, vector<8x1xf32>
    %c0_1 = arith.constant 0 : index
    %c1 = arith.constant 1 : index
    %1 = vector.load %arg4[%c0_1, %c1] : memref<8x4xf32, #tpu.memory_space<vmem>>, vector<8x1xf32>
    %c0_2 = arith.constant 0 : index
    %c2 = arith.constant 2 : index
    %2 = vector.load %arg4[%c0_2, %c2] : memref<8x4xf32, #tpu.memory_space<vmem>>, vector<8x1xf32>
    %c0_3 = arith.constant 0 : index
    %c3 = arith.constant 3 : index
    %3 = vector.load %arg4[%c0_3, %c3] : memref<8x4xf32, #tpu.memory_space<vmem>>, vector<8x1xf32>
    %c0_4 = arith.constant 0 : index
    %c0_5 = arith.constant 0 : index
    %4 = vector.load %arg5[%c0_4, %c0_5] : memref<8x1xf32, #tpu.memory_space<vmem>>, vector<8x1xf32>
    %c0_i32 = arith.constant 0 : i32
    %c256_i32 = arith.constant 256 : i32
    %5 = arith.muli %c0_i32, %c256_i32 : i32
    %6 = tpu.assume_multiple %5, 256 : i32
    %c0_6 = arith.constant 0 : index
    %c0_7 = arith.constant 0 : index
    %7 = arith.index_cast %6 : i32 to index
    %8 = vector.load %arg3[%c0_6, %c0_7, %7] : memref<1x4x256xf32, #tpu.memory_space<vmem>>, vector<1x4x256xf32>
    %9 = vector.shape_cast %8 : vector<1x4x256xf32> to vector<4x256xf32>
    %10 = vector.extract_strided_slice %9 {offsets = [0, 0], sizes = [1, 256], strides = [1, 1]} : vector<4x256xf32> to vector<1x256xf32>
    %11 = vector.broadcast %0 : vector<8x1xf32> to vector<8x256xf32>
    %12 = vector.broadcast %10 : vector<1x256xf32> to vector<8x256xf32>
    %13 = arith.mulf %11, %12 : vector<8x256xf32>
    %14 = vector.extract_strided_slice %9 {offsets = [1, 0], sizes = [1, 256], strides = [1, 1]} : vector<4x256xf32> to vector<1x256xf32>
    %15 = vector.broadcast %1 : vector<8x1xf32> to vector<8x256xf32>
    %16 = vector.broadcast %14 : vector<1x256xf32> to vector<8x256xf32>
    %17 = arith.mulf %15, %16 : vector<8x256xf32>
    %18 = arith.addf %13, %17 : vector<8x256xf32>
    %19 = vector.extract_strided_slice %9 {offsets = [2, 0], sizes = [1, 256], strides = [1, 1]} : vector<4x256xf32> to vector<1x256xf32>
    %20 = vector.broadcast %2 : vector<8x1xf32> to vector<8x256xf32>
    %21 = vector.broadcast %19 : vector<1x256xf32> to vector<8x256xf32>
    %22 = arith.mulf %20, %21 : vector<8x256xf32>
    %23 = arith.addf %18, %22 : vector<8x256xf32>
    %24 = vector.extract_strided_slice %9 {offsets = [3, 0], sizes = [1, 256], strides = [1, 1]} : vector<4x256xf32> to vector<1x256xf32>
    %25 = vector.broadcast %3 : vector<8x1xf32> to vector<8x256xf32>
    %26 = vector.broadcast %24 : vector<1x256xf32> to vector<8x256xf32>
    %27 = arith.mulf %25, %26 : vector<8x256xf32>
    %28 = arith.addf %23, %27 : vector<8x256xf32>
    %29 = vector.broadcast %4 : vector<8x1xf32> to vector<8x256xf32>
    %30 = arith.addf %28, %29 : vector<8x256xf32>
    %c0_8 = arith.constant 0 : index
    %c0_9 = arith.constant 0 : index
    %31 = arith.index_cast %6 : i32 to index
    %32 = vector.load %arg6[%c0_8, %c0_9, %31] : memref<1x8x256xf32, #tpu.memory_space<vmem>>, vector<1x8x256xf32>
    %33 = vector.shape_cast %32 : vector<1x8x256xf32> to vector<8x256xf32>
    %34 = vector.shape_cast %30 : vector<8x256xf32> to vector<1x8x256xf32>
    tpu.vector_store %arg6[%c0_8, %c0_9, %31], %34 {strides = array<i32>} : memref<1x8x256xf32, #tpu.memory_space<vmem>>, vector<1x8x256xf32>,
    %c1_i32 = arith.constant 1 : i32
    return
  }
  func.func @transform_0(%arg0: i32, %arg1: i32, %arg2: i32) -> (i32, i32, i32) {
    %c0_i32 = arith.constant 0 : i32
    %c0_i32_0 = arith.constant 0 : i32
    return %arg0, %c0_i32, %arg1 : i32, i32, i32
  }
  func.func @transform_1(%arg0: i32, %arg1: i32, %arg2: i32) -> (i32, i32) {
    %c0_i32 = arith.constant 0 : i32
    %c0_i32_0 = arith.constant 0 : i32
    return %arg2, %c0_i32 : i32, i32
  }
  func.func @transform_2(%arg0: i32, %arg1: i32, %arg2: i32) -> (i32, i32) {
    %c0_i32 = arith.constant 0 : i32
    %c0_i32_0 = arith.constant 0 : i32
    return %arg2, %c0_i32 : i32, i32
  }
  func.func @transform_3(%arg0: i32, %arg1: i32, %arg2: i32) -> (i32, i32, i32) {
    %c0_i32 = arith.constant 0 : i32
    return %arg0, %arg2, %arg1 : i32, i32, i32
  }
}

module attributes {stable_mosaic.version = 11 : i64} {
  func.func @_conv1x1_vpu_kernel(%arg0: i32, %arg1: i32, %arg2: i32, %arg3: memref<1x4x256xf32, #tpu.memory_space<vmem>>, %arg4: memref<8x4xf32, #tpu.memory_space<vmem>>, %arg5: memref<8x1xf32, #tpu.memory_space<vmem>>, %arg6: memref<1x8x256xf32, #tpu.memory_space<vmem>>) attributes {dimension_semantics = [#tpu.dimension_semantics<parallel>, #tpu.dimension_semantics<parallel>, #tpu.dimension_semantics<parallel>], iteration_bounds = array<i64: 2, 1, 1>, scalar_prefetch = 0 : i64, scratch_operands = 0 : i64, tpu.core_type = #tpu.core_type<tc>, window_params = [{transform_indices = @transform_0, window_bounds = array<i64: 1, 4, 256>}, {transform_indices = @transform_1, window_bounds = array<i64: 8, 4>}, {transform_indices = @transform_2, window_bounds = array<i64: 8, 1>}, {transform_indices = @transform_3, window_bounds = array<i64: 1, 8, 256>}]} {
    %c0 = arith.constant 0 : index
    %c0_0 = arith.constant 0 : index
    %0 = vector.load %arg4[%c0, %c0_0] : memref<8x4xf32, #tpu.memory_space<vmem>>, vector<8x1xf32>
    %c0_1 = arith.constant 0 : index
    %c1 = arith.constant 1 : index
    %1 = vector.load %arg4[%c0_1, %c1] : memref<8x4xf32, #tpu.memory_space<vmem>>, vector<8x1xf32>
    %c0_2 = arith.constant 0 : index
    %c2 = arith.constant 2 : index
    %2 = vector.load %arg4[%c0_2, %c2] : memref<8x4xf32, #tpu.memory_space<vmem>>, vector<8x1xf32>
    %c0_3 = arith.constant 0 : index
    %c3 = arith.constant 3 : index
    %3 = vector.load %arg4[%c0_3, %c3] : memref<8x4xf32, #tpu.memory_space<vmem>>, vector<8x1xf32>
    %c0_4 = arith.constant 0 : index
    %c0_5 = arith.constant 0 : index
    %4 = vector.load %arg5[%c0_4, %c0_5] : memref<8x1xf32, #tpu.memory_space<vmem>>, vector<8x1xf32>
    %c0_i32 = arith.constant 0 : i32
    %c256_i32 = arith.constant 256 : i32
    %5 = arith.muli %c0_i32, %c256_i32 : i32
    %6 = tpu.assume_multiple %5, 256 : i32
    %c0_6 = arith.constant 0 : index
    %c0_7 = arith.constant 0 : index
    %7 = arith.index_cast %6 : i32 to index
    %8 = vector.load %arg3[%c0_6, %c0_7, %7] : memref<1x4x256xf32, #tpu.memory_space<vmem>>, vector<1x4x256xf32>
    %9 = vector.shape_cast %8 : vector<1x4x256xf32> to vector<4x256xf32>
    %10 = vector.extract_strided_slice %9 {offsets = [0, 0], sizes = [1, 256], strides = [1, 1]} : vector<4x256xf32> to vector<1x256xf32>
    %11 = vector.broadcast %0 : vector<8x1xf32> to vector<8x256xf32>
    %12 = vector.broadcast %10 : vector<1x256xf32> to vector<8x256xf32>
    %13 = arith.mulf %11, %12 : vector<8x256xf32>
    %14 = vector.extract_strided_slice %9 {offsets = [1, 0], sizes = [1, 256], strides = [1, 1]} : vector<4x256xf32> to vector<1x256xf32>
    %15 = vector.broadcast %1 : vector<8x1xf32> to vector<8x256xf32>
    %16 = vector.broadcast %14 : vector<1x256xf32> to vector<8x256xf32>
    %17 = arith.mulf %15, %16 : vector<8x256xf32>
    %18 = arith.addf %13, %17 : vector<8x256xf32>
    %19 = vector.extract_strided_slice %9 {offsets = [2, 0], sizes = [1, 256], strides = [1, 1]} : vector<4x256xf32> to vector<1x256xf32>
    %20 = vector.broadcast %2 : vector<8x1xf32> to vector<8x256xf32>
    %21 = vector.broadcast %19 : vector<1x256xf32> to vector<8x256xf32>
    %22 = arith.mulf %20, %21 : vector<8x256xf32>
    %23 = arith.addf %18, %22 : vector<8x256xf32>
    %24 = vector.extract_strided_slice %9 {offsets = [3, 0], sizes = [1, 256], strides = [1, 1]} : vector<4x256xf32> to vector<1x256xf32>
    %25 = vector.broadcast %3 : vector<8x1xf32> to vector<8x256xf32>
    %26 = vector.broadcast %24 : vector<1x256xf32> to vector<8x256xf32>
    %27 = arith.mulf %25, %26 : vector<8x256xf32>
    %28 = arith.addf %23, %27 : vector<8x256xf32>
    %29 = vector.broadcast %4 : vector<8x1xf32> to vector<8x256xf32>
    %30 = arith.addf %28, %29 : vector<8x256xf32>
    %c0_8 = arith.constant 0 : index
    %c0_9 = arith.constant 0 : index
    %31 = arith.index_cast %6 : i32 to index
    %32 = vector.load %arg6[%c0_8, %c0_9, %31] : memref<1x8x256xf32, #tpu.memory_space<vmem>>, vector<1x8x256xf32>
    %33 = vector.shape_cast %32 : vector<1x8x256xf32> to vector<8x256xf32>
    %34 = vector.shape_cast %30 : vector<8x256xf32> to vector<1x8x256xf32>
    tpu.vector_store %arg6[%c0_8, %c0_9, %31], %34 {strides = array<i32>} : memref<1x8x256xf32, #tpu.memory_space<vmem>>, vector<1x8x256xf32>,
    %c1_i32 = arith.constant 1 : i32
    return
  }
  func.func @transform_0(%arg0: i32, %arg1: i32, %arg2: i32) -> (i32, i32, i32) {
    %c0_i32 = arith.constant 0 : i32
    %c0_i32_0 = arith.constant 0 : i32
    return %arg0, %c0_i32, %arg1 : i32, i32, i32
  }
  func.func @transform_1(%arg0: i32, %arg1: i32, %arg2: i32) -> (i32, i32) {
    %c0_i32 = arith.constant 0 : i32
    %c0_i32_0 = arith.constant 0 : i32
    return %arg2, %c0_i32 : i32, i32
  }
  func.func @transform_2(%arg0: i32, %arg1: i32, %arg2: i32) -> (i32, i32) {
    %c0_i32 = arith.constant 0 : i32
    %c0_i32_0 = arith.constant 0 : i32
    return %arg2, %c0_i32 : i32, i32
  }
  func.func @transform_3(%arg0: i32, %arg1: i32, %arg2: i32) -> (i32, i32, i32) {
    %c0_i32 = arith.constant 0 : i32
    return %arg0, %arg2, %arg1 : i32, i32, i32
  }
}

</mosaic_0001>

<bundles_post_ra>
// kernel: tpu_custom_call.1
= control target key start
LH: loop header
LB: loop body
LE: loop exit
PB: predicated region body
PF: predicated region fallthrough
CT: control target
= control target key end

     0   :  { %8 = vsyncpa [#allocation3], 0  ;;  %s798_s0 = inlined_call_operand.vmem [shape: f32[2,4,256], index: 0, kind: input, shape index: {}]   ;;  %s799_s1 = inlined_call_operand.vmem [shape: f32[8,4], index: 1, kind: input, shape index: {}]   ;;  %s800_s2 = inlined_call_operand.vmem [shape: f32[8,1], index: 2, kind: input, shape index: {}]   ;;  %s801_s3 = inlined_call_operand.hbm [shape: f32[2,8,256], index: 3, kind: output, shape index: {}]  }
   0x1   :  { %10 = vsyncpa [#allocation3 + $0x1], 0  ;;  %s676_s12 = smov 0   ;;  %s678_s13 = smov 0  }
   0x2   :  { %s680_s14 = smov 0   ;;  %s682_s15 = smov 0  }
   0x3   :  { %s684_s16 = smov 0   ;;  %s686_s17 = smov 0  }
   0x4 LB: > { %s489_s18 = sadd.s32 4294967295, %s649_s17   ;;  %s490_s19 = sadd.s32 4294967294, %s649_s17   ;;  %s649_s17 = sphi %s686_s17, %s16_s17   ;;  %s645_s16 = sphi %s684_s16, %s808_s16   ;;  %s641_s15 = sphi %s682_s15, %s807_s15   ;;  %s637_s14 = sphi %s680_s14, %s806_s14   ;;  %s633_s13 = sphi %s678_s13, %s805_s13   ;;  %s629_s12 = sphi %s676_s12, %s804_s12  }
   0x5   : > { %s35_s20 = sadd.s32 1, %s645_s16  ;;  %s126_s21 = sadd.s32 1, %s637_s14 }
   0x6   : > { %p37_p0 = scmp.ge.s32.totalorder %s35_s20, 2  ;;  %p136_p1 = scmp.ne.s32.totalorder %s637_s14, %s633_s13 }
   0x7   : > { %p137_p2 = scmp.eq.s32.totalorder %s489_s18, 1  ;;  %p142_p3 = scmp.ne.s32.totalorder %s633_s13, %s629_s12 }
   0x8   : > { %s810_s20 = smov (%p37_p0, %s35_s20), 0  ;;  %p143_p5 = scmp.eq.s32.totalorder %s490_s19, 1 }
   0x9   : > { %p716_p4 = por %p137_p2, %p136_p1  ;;  %s119_s23 = ssub.s32 %s645_s16, %s810_s20 }
   0xa   : > { %p495_p6 = scmp.ge.s32.totalorder %s649_s17, 1  ;;  %p124_p7 = scmp.eq.s32.totalorder %s119_s23, 0 }
   0xb   : > { %p723_p8 = por %p143_p5, %p142_p3  ;;  %p188_p9 = scmp.lt.s32.totalorder %s649_s17, 3 }
   0xc   : > { %s729_s25 = scalar_select %p124_p7, %s637_s14, %s126_s21  }
   0xd   : > { %p189_p10 = pnand %p495_p6, %p188_p9 }
   0xe   : > { %v243_v0 = vld [vmem:[%s799_s1] sm:$0xff] (!%p189_p10)  ;;  %v651_v1 = vmov (!%p189_p10), 0   ;;  %v652_v2 = vmov (!%p189_p10), 2   ;;  %v653_v3 = vmov (!%p189_p10), 1   ;;  %v654_v4 = vmov (!%p189_p10), 3   ;;  %p225_p11 = scmp.lt.s32.totalorder (!%p189_p10), %s641_s15, 1 }
   0xf   : > { %192 = sbr.rel (%p189_p10) target bundleno = 173 (0xad), region = 32  ;;  %565 = vset.pattern.permute.xlu0 (!%p189_p10), %v651_v1  ;;  %567 = vset.pattern.permute.xlu1 (!%p189_p10), %v652_v2  ;;  %v244_v5 = vld [vmem:[%s800_s2] sm:$0xff] (!%p189_p10)  ;;  %v252_v6 = vlaneseq (!%p189_p10)  ;;  %s221_s8 = sand.u32 (!%p189_p10), 1, %s633_s13  }
  0x10   : > { %248 = vperm.xlu0 (!%p189_p10), %565, %v243_v0   ;;  %299 = vperm.xlu1 (!%p189_p10), %567, %v243_v0   ;;  %s496_s9 = sshll.u32 (!%p189_p10), %s221_s8, 4  ;;  %s505_s10 = sshll.u32 (!%p189_p10), %s641_s15, 8 }
  0x11   : > { %v253_v7 = vshrl.u32 (!%p189_p10), %v252_v6, 7  ;;  %s223_s11 = scalar_lea.vmem (!%p189_p10), [#allocation2], %s496_s9  ;;  %s749_s23 = scalar_lea.hbm (!%p189_p10), %s801_s3, %s505_s10 }
  0x12   : > { %s378_s18 = sshll.u32 (!%p189_p10), %s223_s11, 4  ;;  %s655_s27 = smov (!%p189_p10), [#allocation2]   ;;  %s751_s18 = int_to_ptr.vmem [resolvable:$true] %s378_s18 }
  0x13   : > { %v254_v8 = vsub.s32 (!%p189_p10), 0, %v253_v7  ;;  %v258_v9 = vsub.s32 (!%p189_p10), 4, %v253_v7  ;;  %v278_v10 = vsub.s32 (!%p189_p10), 1, %v253_v7  ;;  %v282_v11 = vsub.s32 (!%p189_p10), 5, %v253_v7  ;;  %s571_s26 = scalar_lea.vmem (!%p189_p10), %s751_s18, 256  ;;  %s575_s28 = sshll.u32 (!%p189_p10), %s655_s27, 4  ;;  %s576_s28 = int_to_ptr.vmem [resolvable:$false] %s575_s28 }
  0x14   : > { %566 = vset.pattern.permute.xlu0 (!%p189_p10), %v653_v3  ;;  %568 = vset.pattern.permute.xlu1 (!%p189_p10), %v654_v4  ;;  %v304_v13 = vsub.s32 (!%p189_p10), 2, %v253_v7  ;;  %v308_v14 = vsub.s32 (!%p189_p10), 6, %v253_v7  ;;  %v330_v15 = vsub.s32 (!%p189_p10), 3, %v253_v7  ;;  %v334_v16 = vsub.s32 (!%p189_p10), 7, %v253_v7  ;;  %p572_p12 = scmp.ne.s32.totalorder (!%p189_p10), %s751_s18, %s571_s26  ;;  %s577_s29 = scalar_lea.vmem (!%p189_p10), %s576_s28, 512 }
  0x15   : > { %273 = vperm.xlu0 (!%p189_p10), %566, %v243_v0   ;;  %325 = vperm.xlu1 (!%p189_p10), %568, %v243_v0   ;;  %p578_p1 = scmp.lt.s32.totalorder (!%p189_p10), %s751_s18, %s576_s28  ;;  %p579_p2 = scmp.lt.s32.totalorder (!%p189_p10), %s577_s29, %s571_s26 }
  0x16   : > { %s226_s30 = scalar_select %p225_p11, %s641_s15, 1 }
  0x17   : > { %s360_s15 = scalar_lea.sflag [#allocation3], %s221_s8  ;;  %p573_p13 = pnand %p572_p12, %p716_p4 }
  0x18   : > { %s504_s4 = sshll.u32 %s226_s30, 3  ;;  %p580_p3 = por %p579_p2, %p578_p1 }
  0x19   : > { %569 = vset.pattern.permute.xlu1 %v651_v1  ;;  %570 = vset.pattern.permute.xlu0 %v651_v1  ;;  %s232_s7 = scalar_lea.vmem %s798_s0, %s504_s4  ;;  %p574_p0 = pneg %p573_p13 }
  0x1a   : > { %352 = vperm.xlu1 %569, %v244_v5   ;;  %v245_v12 = vld [vmem:[%s232_s7] sm:$0xff] }
  0x1b   : > { %v255_v17 = vrot.slane %v245_v12, %v254_v8  ;;  %v259_v18 = vrot.slane %v245_v12, %v258_v9  ;;  %v279_v19 = vrot.slane %v245_v12, %v278_v10  ;;  %v283_v20 = vrot.slane %v245_v12, %v282_v11  ;;  %p581_p5 = pnand %p580_p3, %p574_p0 }
  0x1c   : > { %v305_v21 = vrot.slane %v245_v12, %v304_v13  ;;  %v309_v22 = vrot.slane %v245_v12, %v308_v14  ;;  %v331_v25 = vrot.slane %v245_v12, %v330_v15  ;;  %v335_v26 = vrot.slane %v245_v12, %v334_v16 }
  0x1d   : > { %v265_v27 = vrot.slane %v255_v17, %v254_v8  ;;  %v269_v28 = vrot.slane %v259_v18, %v254_v8  ;;  %v289_v29 = vrot.slane %v279_v19, %v278_v10  ;;  %v293_v30 = vrot.slane %v283_v20, %v278_v10 }
  0x1e   : > { %v315_v31 = vrot.slane %v305_v21, %v304_v13  ;;  %v319_v32 = vrot.slane %v309_v22, %v304_v13  ;;  %v341_v33 = vrot.slane %v331_v25, %v330_v15  ;;  %v345_v34 = vrot.slane %v335_v26, %v330_v15 }
  0x8f   : > { %v249_v23 = vpop.permute.xlu0 %248  ;;  %v300_v24 = vpop.permute.xlu1 %299 }
  0x90   : > { %v270_v37 = vmul.f32 %v265_v27, %v249_v23  ;;  %v271_v38 = vmul.f32 %v269_v28, %v249_v23  ;;  %v320_v41 = vmul.f32 %v315_v31, %v300_v24  ;;  %v321_v42 = vmul.f32 %v319_v32, %v300_v24 }
  0x94   : > { %v274_v35 = vpop.permute.xlu0 %273  ;;  %v326_v36 = vpop.permute.xlu1 %325 }
  0x95   : > { %v294_v39 = vmul.f32 %v289_v29, %v274_v35  ;;  %v295_v40 = vmul.f32 %v293_v30, %v274_v35  ;;  %v346_v45 = vmul.f32 %v341_v33, %v326_v36  ;;  %v347_v46 = vmul.f32 %v345_v34, %v326_v36 }
  0x97   : > { %v296_v43 = vadd.f32 %v294_v39, %v270_v37  ;;  %v297_v44 = vadd.f32 %v295_v40, %v271_v38 }
  0x99   : > { %v322_v47 = vadd.f32 %v320_v41, %v296_v43  ;;  %v323_v48 = vadd.f32 %v321_v42, %v297_v44  ;;  %v353_v49 = vpop.permute.xlu1 %352 }
  0x9b   : > { %v348_v50 = vadd.f32 %v346_v45, %v322_v47  ;;  %v349_v51 = vadd.f32 %v347_v46, %v323_v48 }
  0x9d   : > { %v355_v52 = vadd.f32 %v353_v49, %v348_v50  ;;  %v356_v53 = vadd.f32 %v353_v49, %v349_v51 }
  0x9f   : > { %357 = vst [vmem:[%s223_s11] sm:$0xff] %v355_v52  ;;  %358 = vst [vmem:[%s223_s11 + $0x8] sm:$0xff] %v356_v53 }
  0xa0   : > { %584 = shalt.err (!%p581_p5)
}
  0xa1   : > { %s585_s30 = scalar_lea.hbm %s749_s23, 256  ;;  %s589_s6 = scalar_lea.hbm %s801_s3, 512 }
  0xa2   : > { %p586_p6 = scmp.ne.s32.totalorder %s749_s23, %s585_s30  ;;  %p590_p10 = scmp.lt.u32.totalorder %s749_s23, %s801_s3 }
  0xa3   : > { %p591_p11 = scmp.lt.u32.totalorder %s589_s6, %s585_s30  ;;  %p593_p13 = scmp.lt.u32.totalorder %s585_s30, %s749_s23 }
  0xa4   : > { %p587_p7 = pnand %p586_p6, %p716_p4 }
  0xa5   : > { %p592_p12 = por %p591_p11, %p590_p10 }
  0xa6   : > { %p588_p9 = pneg %p587_p7 }
  0xa7   : > { %p594_p0 = por %p593_p13, %p592_p12 }
  0xa9   : > { %p595_p1 = pnand %p594_p0, %p588_p9 }
  0xab   : > { %598 = shalt.err (!%p595_p1)
}
  0xac   : > { %506 = dma.vmem_to_hbm [thread:$0]  (%p716_p4), %s751_s18, 256, %s749_s23, %s360_s15  }
  0xad PF: > { %p512_p2 = scmp.ge.s32.totalorder %s649_s17, 2  ;;  %s390_s9 = sand.u32 1, %s629_s12  }
  0xae   : > { %s391_s10 = scalar_lea.sflag [#allocation3], %s390_s9 }
  0xaf   : > { %p509_p3 = pnand %p512_p2, %p723_p8 }
  0xb1   : > { %624 = dma.done.wait (!%p509_p3), %s391_s10, 256  }
  0xb2   : > { %626 = vsyncadd (!%p509_p3), %s391_s10, 4294967040  ;;  %s16_s17 = sadd.s32 1, %s649_s17   ;;  %s804_s12 = smov %s633_s13 }
  0xb3   : > { %p13_p5 = scmp.ge.s32.totalorder %s16_s17, 4   ;;  %s805_s13 = smov %s637_s14 }
  0xb4   : > { %s806_s14 = smov %s729_s25  ;;  %s807_s15 = smov %s645_s16 }
  0xb5   : > { %s808_s16 = smov %s810_s20  ;;  %15 = sbr.rel (!%p13_p5) target bundleno = 4 (0x4), region = 73 }
  0xbc   :  { %396 = vsyncpa [#allocation3], 1 }
  0xbd   :  { %398 = vsyncpa [#allocation3 + $0x1], 1 }

// kernel: tpu_custom_call.1
= control target key start
LH: loop header
LB: loop body
LE: loop exit
PB: predicated region body
PF: predicated region fallthrough
CT: control target
= control target key end

     0   :  { %8 = vsyncpa [#allocation3], 0  ;;  %s798_s0 = inlined_call_operand.vmem [shape: f32[2,4,256], index: 0, kind: input, shape index: {}]   ;;  %s799_s1 = inlined_call_operand.vmem [shape: f32[8,4], index: 1, kind: input, shape index: {}]   ;;  %s800_s2 = inlined_call_operand.vmem [shape: f32[8,1], index: 2, kind: input, shape index: {}]   ;;  %s801_s3 = inlined_call_operand.hbm [shape: f32[2,8,256], index: 3, kind: output, shape index: {}]  }
   0x1   :  { %10 = vsyncpa [#allocation3 + $0x1], 0  ;;  %s676_s12 = smov 0   ;;  %s678_s13 = smov 0  }
   0x2   :  { %s680_s14 = smov 0   ;;  %s682_s15 = smov 0  }
   0x3   :  { %s684_s16 = smov 0   ;;  %s686_s17 = smov 0  }
   0x4 LB: > { %s489_s18 = sadd.s32 4294967295, %s649_s17   ;;  %s490_s19 = sadd.s32 4294967294, %s649_s17   ;;  %s649_s17 = sphi %s686_s17, %s16_s17   ;;  %s645_s16 = sphi %s684_s16, %s808_s16   ;;  %s641_s15 = sphi %s682_s15, %s807_s15   ;;  %s637_s14 = sphi %s680_s14, %s806_s14   ;;  %s633_s13 = sphi %s678_s13, %s805_s13   ;;  %s629_s12 = sphi %s676_s12, %s804_s12  }
   0x5   : > { %s35_s20 = sadd.s32 1, %s645_s16  ;;  %s126_s21 = sadd.s32 1, %s637_s14 }
   0x6   : > { %p37_p0 = scmp.ge.s32.totalorder %s35_s20, 2  ;;  %p136_p1 = scmp.ne.s32.totalorder %s637_s14, %s633_s13 }
   0x7   : > { %p137_p2 = scmp.eq.s32.totalorder %s489_s18, 1  ;;  %p142_p3 = scmp.ne.s32.totalorder %s633_s13, %s629_s12 }
   0x8   : > { %s810_s20 = smov (%p37_p0, %s35_s20), 0  ;;  %p143_p5 = scmp.eq.s32.totalorder %s490_s19, 1 }
   0x9   : > { %p716_p4 = por %p137_p2, %p136_p1  ;;  %s119_s23 = ssub.s32 %s645_s16, %s810_s20 }
   0xa   : > { %p495_p6 = scmp.ge.s32.totalorder %s649_s17, 1  ;;  %p124_p7 = scmp.eq.s32.totalorder %s119_s23, 0 }
   0xb   : > { %p723_p8 = por %p143_p5, %p142_p3  ;;  %p188_p9 = scmp.lt.s32.totalorder %s649_s17, 3 }
   0xc   : > { %s729_s25 = scalar_select %p124_p7, %s637_s14, %s126_s21  }
   0xd   : > { %p189_p10 = pnand %p495_p6, %p188_p9 }
   0xe   : > { %v243_v0 = vld [vmem:[%s799_s1] sm:$0xff] (!%p189_p10)  ;;  %v651_v1 = vmov (!%p189_p10), 0   ;;  %v652_v2 = vmov (!%p189_p10), 2   ;;  %v653_v3 = vmov (!%p189_p10), 1   ;;  %v654_v4 = vmov (!%p189_p10), 3   ;;  %p225_p11 = scmp.lt.s32.totalorder (!%p189_p10), %s641_s15, 1 }
   0xf   : > { %192 = sbr.rel (%p189_p10) target bundleno = 173 (0xad), region = 32  ;;  %565 = vset.pattern.permute.xlu0 (!%p189_p10), %v651_v1  ;;  %567 = vset.pattern.permute.xlu1 (!%p189_p10), %v652_v2  ;;  %v244_v5 = vld [vmem:[%s800_s2] sm:$0xff] (!%p189_p10)  ;;  %v252_v6 = vlaneseq (!%p189_p10)  ;;  %s221_s8 = sand.u32 (!%p189_p10), 1, %s633_s13  }
  0x10   : > { %248 = vperm.xlu0 (!%p189_p10), %565, %v243_v0   ;;  %299 = vperm.xlu1 (!%p189_p10), %567, %v243_v0   ;;  %s496_s9 = sshll.u32 (!%p189_p10), %s221_s8, 4  ;;  %s505_s10 = sshll.u32 (!%p189_p10), %s641_s15, 8 }
  0x11   : > { %v253_v7 = vshrl.u32 (!%p189_p10), %v252_v6, 7  ;;  %s223_s11 = scalar_lea.vmem (!%p189_p10), [#allocation2], %s496_s9  ;;  %s749_s23 = scalar_lea.hbm (!%p189_p10), %s801_s3, %s505_s10 }
  0x12   : > { %s378_s18 = sshll.u32 (!%p189_p10), %s223_s11, 4  ;;  %s655_s27 = smov (!%p189_p10), [#allocation2]   ;;  %s751_s18 = int_to_ptr.vmem [resolvable:$true] %s378_s18 }
  0x13   : > { %v254_v8 = vsub.s32 (!%p189_p10), 0, %v253_v7  ;;  %v258_v9 = vsub.s32 (!%p189_p10), 4, %v253_v7  ;;  %v278_v10 = vsub.s32 (!%p189_p10), 1, %v253_v7  ;;  %v282_v11 = vsub.s32 (!%p189_p10), 5, %v253_v7  ;;  %s571_s26 = scalar_lea.vmem (!%p189_p10), %s751_s18, 256  ;;  %s575_s28 = sshll.u32 (!%p189_p10), %s655_s27, 4  ;;  %s576_s28 = int_to_ptr.vmem [resolvable:$false] %s575_s28 }
  0x14   : > { %566 = vset.pattern.permute.xlu0 (!%p189_p10), %v653_v3  ;;  %568 = vset.pattern.permute.xlu1 (!%p189_p10), %v654_v4  ;;  %v304_v13 = vsub.s32 (!%p189_p10), 2, %v253_v7  ;;  %v308_v14 = vsub.s32 (!%p189_p10), 6, %v253_v7  ;;  %v330_v15 = vsub.s32 (!%p189_p10), 3, %v253_v7  ;;  %v334_v16 = vsub.s32 (!%p189_p10), 7, %v253_v7  ;;  %p572_p12 = scmp.ne.s32.totalorder (!%p189_p10), %s751_s18, %s571_s26  ;;  %s577_s29 = scalar_lea.vmem (!%p189_p10), %s576_s28, 512 }
  0x15   : > { %273 = vperm.xlu0 (!%p189_p10), %566, %v243_v0   ;;  %325 = vperm.xlu1 (!%p189_p10), %568, %v243_v0   ;;  %p578_p1 = scmp.lt.s32.totalorder (!%p189_p10), %s751_s18, %s576_s28  ;;  %p579_p2 = scmp.lt.s32.totalorder (!%p189_p10), %s577_s29, %s571_s26 }
  0x16   : > { %s226_s30 = scalar_select %p225_p11, %s641_s15, 1 }
  0x17   : > { %s360_s15 = scalar_lea.sflag [#allocation3], %s221_s8  ;;  %p573_p13 = pnand %p572_p12, %p716_p4 }
  0x18   : > { %s504_s4 = sshll.u32 %s226_s30, 3  ;;  %p580_p3 = por %p579_p2, %p578_p1 }
  0x19   : > { %569 = vset.pattern.permute.xlu1 %v651_v1  ;;  %570 = vset.pattern.permute.xlu0 %v651_v1  ;;  %s232_s7 = scalar_lea.vmem %s798_s0, %s504_s4  ;;  %p574_p0 = pneg %p573_p13 }
  0x1a   : > { %352 = vperm.xlu1 %569, %v244_v5   ;;  %v245_v12 = vld [vmem:[%s232_s7] sm:$0xff] }
  0x1b   : > { %v255_v17 = vrot.slane %v245_v12, %v254_v8  ;;  %v259_v18 = vrot.slane %v245_v12, %v258_v9  ;;  %v279_v19 = vrot.slane %v245_v12, %v278_v10  ;;  %v283_v20 = vrot.slane %v245_v12, %v282_v11  ;;  %p581_p5 = pnand %p580_p3, %p574_p0 }
  0x1c   : > { %v305_v21 = vrot.slane %v245_v12, %v304_v13  ;;  %v309_v22 = vrot.slane %v245_v12, %v308_v14  ;;  %v331_v25 = vrot.slane %v245_v12, %v330_v15  ;;  %v335_v26 = vrot.slane %v245_v12, %v334_v16 }
  0x1d   : > { %v265_v27 = vrot.slane %v255_v17, %v254_v8  ;;  %v269_v28 = vrot.slane %v259_v18, %v254_v8  ;;  %v289_v29 = vrot.slane %v279_v19, %v278_v10  ;;  %v293_v30 = vrot.slane %v283_v20, %v278_v10 }
  0x1e   : > { %v315_v31 = vrot.slane %v305_v21, %v304_v13  ;;  %v319_v32 = vrot.slane %v309_v22, %v304_v13  ;;  %v341_v33 = vrot.slane %v331_v25, %v330_v15  ;;  %v345_v34 = vrot.slane %v335_v26, %v330_v15 }
  0x8f   : > { %v249_v23 = vpop.permute.xlu0 %248  ;;  %v300_v24 = vpop.permute.xlu1 %299 }
  0x90   : > { %v270_v37 = vmul.f32 %v265_v27, %v249_v23  ;;  %v271_v38 = vmul.f32 %v269_v28, %v249_v23  ;;  %v320_v41 = vmul.f32 %v315_v31, %v300_v24  ;;  %v321_v42 = vmul.f32 %v319_v32, %v300_v24 }
  0x94   : > { %v274_v35 = vpop.permute.xlu0 %273  ;;  %v326_v36 = vpop.permute.xlu1 %325 }
  0x95   : > { %v294_v39 = vmul.f32 %v289_v29, %v274_v35  ;;  %v295_v40 = vmul.f32 %v293_v30, %v274_v35  ;;  %v346_v45 = vmul.f32 %v341_v33, %v326_v36  ;;  %v347_v46 = vmul.f32 %v345_v34, %v326_v36 }
  0x97   : > { %v296_v43 = vadd.f32 %v294_v39, %v270_v37  ;;  %v297_v44 = vadd.f32 %v295_v40, %v271_v38 }
  0x99   : > { %v322_v47 = vadd.f32 %v320_v41, %v296_v43  ;;  %v323_v48 = vadd.f32 %v321_v42, %v297_v44  ;;  %v353_v49 = vpop.permute.xlu1 %352 }
  0x9b   : > { %v348_v50 = vadd.f32 %v346_v45, %v322_v47  ;;  %v349_v51 = vadd.f32 %v347_v46, %v323_v48 }
  0x9d   : > { %v355_v52 = vadd.f32 %v353_v49, %v348_v50  ;;  %v356_v53 = vadd.f32 %v353_v49, %v349_v51 }
  0x9f   : > { %357 = vst [vmem:[%s223_s11] sm:$0xff] %v355_v52  ;;  %358 = vst [vmem:[%s223_s11 + $0x8] sm:$0xff] %v356_v53 }
  0xa0   : > { %584 = shalt.err (!%p581_p5)
}
  0xa1   : > { %s585_s30 = scalar_lea.hbm %s749_s23, 256  ;;  %s589_s6 = scalar_lea.hbm %s801_s3, 512 }
  0xa2   : > { %p586_p6 = scmp.ne.s32.totalorder %s749_s23, %s585_s30  ;;  %p590_p10 = scmp.lt.u32.totalorder %s749_s23, %s801_s3 }
  0xa3   : > { %p591_p11 = scmp.lt.u32.totalorder %s589_s6, %s585_s30  ;;  %p593_p13 = scmp.lt.u32.totalorder %s585_s30, %s749_s23 }
  0xa4   : > { %p587_p7 = pnand %p586_p6, %p716_p4 }
  0xa5   : > { %p592_p12 = por %p591_p11, %p590_p10 }
  0xa6   : > { %p588_p9 = pneg %p587_p7 }
  0xa7   : > { %p594_p0 = por %p593_p13, %p592_p12 }
  0xa9   : > { %p595_p1 = pnand %p594_p0, %p588_p9 }
  0xab   : > { %598 = shalt.err (!%p595_p1)
}
  0xac   : > { %506 = dma.vmem_to_hbm [thread:$0]  (%p716_p4), %s751_s18, 256, %s749_s23, %s360_s15  }
  0xad PF: > { %p512_p2 = scmp.ge.s32.totalorder %s649_s17, 2  ;;  %s390_s9 = sand.u32 1, %s629_s12  }
  0xae   : > { %s391_s10 = scalar_lea.sflag [#allocation3], %s390_s9 }
  0xaf   : > { %p509_p3 = pnand %p512_p2, %p723_p8 }
  0xb1   : > { %624 = dma.done.wait (!%p509_p3), %s391_s10, 256  }
  0xb2   : > { %626 = vsyncadd (!%p509_p3), %s391_s10, 4294967040  ;;  %s16_s17 = sadd.s32 1, %s649_s17   ;;  %s804_s12 = smov %s633_s13 }
  0xb3   : > { %p13_p5 = scmp.ge.s32.totalorder %s16_s17, 4   ;;  %s805_s13 = smov %s637_s14 }
  0xb4   : > { %s806_s14 = smov %s729_s25  ;;  %s807_s15 = smov %s645_s16 }
  0xb5   : > { %s808_s16 = smov %s810_s20  ;;  %15 = sbr.rel (!%p13_p5) target bundleno = 4 (0x4), region = 73 }
  0xbc   :  { %396 = vsyncpa [#allocation3], 1 }
  0xbd   :  { %398 = vsyncpa [#allocation3 + $0x1], 1 }

</bundles_post_ra>
